<compile_context>
chip_gen: v6e
topology: v6e:2x2x1
jax: 0.10.0
libtpu: 0.0.40
codegen_flags: <defaults>
</compile_context>

<pallas_src>
import jax
import jax.numpy as jnp
from jax.experimental import pallas as pl
from jax.experimental.pallas import tpu as pltpu


def _make_fused_mlp_kernel(n_layers):
    """Fused MLP kernel body for a variable number of Linear layers.

    Ref layout (positional): x_ref, w0, b0, w1, b1, ..., w{L-1}, b{L-1}, o_ref
      x_ref : (TB, Din)        f32
      wi    : (Din_i, Dout_i)  f32  (already transposed to (in, out))
      bi    : (1, Dout_i)      f32
      o_ref : (1, 1, TB)       f32  (lane-dense: batch on the 128-lane axis)
    """

    def kernel(x_ref, *refs):
        o_ref = refs[-1]
        h = x_ref[...]                                      # (TB, Din)
        for i in range(n_layers):
            w = refs[2 * i][...]
            b = refs[2 * i + 1][...]
            h = jnp.dot(h, w, preferred_element_type=jnp.float32) + b
            if i < n_layers - 1:
                h = jnp.maximum(h, 0.0)                     # ReLU
                # nn.Dropout is identity in eval mode -> nothing to do.
        # h is (TB, 1); transpose so batch maps to lanes -> dense stores.
        o_ref[...] = jnp.transpose(h).reshape(o_ref.shape).astype(o_ref.dtype)

    return kernel


def _pick_batch_tile(batch):
    """Largest convenient batch tile that evenly divides `batch`."""
    for tb in (512, 256, 128, 64, 32, 16, 8):
        if batch % tb == 0:
            return tb
    return batch  # tiny / odd batch: single whole-array block


def nnet_forward(x, params, *, batch_tile=None):
    """Fused forward pass: hidden Linear->ReLU->Dropout(identity), final Linear.

    x: (B, Din) f32.  params: list of (W (in,out), b (1,out)) f32 pairs.
    Returns (B, 1) f32.
    """
    B, din = x.shape
    n_layers = len(params)
    assert params[-1][0].shape[1] == 1, "final layer must have 1 output"

    tb = batch_tile or _pick_batch_tile(B)
    if B % tb != 0:
        tb = B
    grid_b = B // tb

    kernel = _make_fused_mlp_kernel(n_layers)

    # Input tile: (TB, Din); weights/biases: whole-array resident VMEM blocks.
    in_specs = [pl.BlockSpec((tb, din), lambda i: (i, 0))]
    flat_params = []
    for w, b in params:
        flat_params += [w, b]
        in_specs.append(pl.BlockSpec(w.shape, lambda i: (0, 0)))
        in_specs.append(pl.BlockSpec(b.shape, lambda i: (0, 0)))

    # Lane-dense output: one (1, 1, TB) row per batch tile.
    out_specs = pl.BlockSpec((1, 1, tb), lambda i: (i, 0, 0))

    out = pl.pallas_call(
        kernel,
        out_shape=jax.ShapeDtypeStruct((grid_b, 1, tb), jnp.float32),
        grid=(grid_b,),
        in_specs=in_specs,
        out_specs=out_specs,
        compiler_params=pltpu.CompilerParams(
            dimension_semantics=("parallel",),
        ),
    )(x, *flat_params)

    # (G, 1, TB) -> (B, 1); element (g, 0, t) is sample g*TB + t.
    return out.reshape(B, 1)


def init_params(key, layer_dims):
    """Deterministic PyTorch-Linear-style init (uniform(-1/sqrt(fan_in), +)).

    Weights are stored pre-transposed (in, out); biases pre-shaped (1, out).
    """
    params = []
    for din, dout in zip(layer_dims[:-1], layer_dims[1:]):
        key, kw, kb = jax.random.split(key, 3)
        bound = 1.0 / jnp.sqrt(jnp.float32(din))
        w = jax.random.uniform(kw, (din, dout), jnp.float32, -bound, bound)
        b = jax.random.uniform(kb, (1, dout), jnp.float32, -bound, bound)
        params.append((w, b))
    return params


def _jax_reference(x, params):
    ref = x
    for w, b in params[:-1]:
        ref = jnp.maximum(ref @ w + b, 0.0)
    return ref @ params[-1][0] + params[-1][1]


if __name__ == "__main__":
    # Small synthetic config consistent with the module:
    #   input_features = x_train.shape[1] = 16
    #   n_hidden_layers = 2 with hidden sizes in [4, 2*16-1]
    #   final layer -> 1 output
    batch = 8
    input_features = 16
    hidden_sizes = [24, 12]            # "trial.suggest_int" stand-ins
    layer_dims = [input_features] + hidden_sizes + [1]

    key = jax.random.PRNGKey(0)
    key, kx, kx2 = jax.random.split(key, 3)
    params = init_params(key, layer_dims)

    # --- small batch (single grid step, whole-array blocks) ---
    x = jax.random.normal(kx, (batch, input_features), jnp.float32)
    out = jax.block_until_ready(nnet_forward(x, params))
    ref = _jax_reference(x, params)
    assert out.shape == (batch, 1), out.shape
    assert jnp.allclose(out, ref, atol=1e-5, rtol=1e-5), "mismatch (small batch)"

    # --- larger batch (exercises the batch-tiled grid + lane-dense output) ---
    big_batch = 1024                   # -> TB=512, grid=(2,), parallel axis
    x2 = jax.random.normal(kx2, (big_batch, input_features), jnp.float32)
    out2 = jax.block_until_ready(nnet_forward(x2, params))
    ref2 = _jax_reference(x2, params)
    assert out2.shape == (big_batch, 1), out2.shape
    assert jnp.allclose(out2, ref2, atol=1e-5, rtol=1e-5), "mismatch (tiled batch)"

    print("KERNEL_OK")
</pallas_src>

<mosaic_0001>
module attributes {stable_mosaic.version = 11 : i64} {
  func.func @kernel(%arg0: i32, %arg1: memref<8x16xf32, #tpu.memory_space<vmem>>, %arg2: memref<16x24xf32, #tpu.memory_space<vmem>>, %arg3: memref<1x24xf32, #tpu.memory_space<vmem>>, %arg4: memref<24x12xf32, #tpu.memory_space<vmem>>, %arg5: memref<1x12xf32, #tpu.memory_space<vmem>>, %arg6: memref<12x1xf32, #tpu.memory_space<vmem>>, %arg7: memref<1x1xf32, #tpu.memory_space<vmem>>, %arg8: memref<1x1x8xf32, #tpu.memory_space<vmem>>) attributes {dimension_semantics = [#tpu.dimension_semantics<parallel>], iteration_bounds = array<i64: 1>, scalar_prefetch = 0 : i64, scratch_operands = 0 : i64, tpu.core_type = #tpu.core_type<tc>, window_params = [{transform_indices = @transform_0, window_bounds = array<i64: 8, 16>}, {pipeline_mode = #tpu.pipeline_mode<synchronous>, transform_indices = @transform_1, window_bounds = array<i64: 16, 24>}, {pipeline_mode = #tpu.pipeline_mode<synchronous>, transform_indices = @transform_2, window_bounds = array<i64: 1, 24>}, {pipeline_mode = #tpu.pipeline_mode<synchronous>, transform_indices = @transform_3, window_bounds = array<i64: 24, 12>}, {pipeline_mode = #tpu.pipeline_mode<synchronous>, transform_indices = @transform_4, window_bounds = array<i64: 1, 12>}, {pipeline_mode = #tpu.pipeline_mode<synchronous>, transform_indices = @transform_5, window_bounds = array<i64: 12, 1>}, {pipeline_mode = #tpu.pipeline_mode<synchronous>, transform_indices = @transform_6, window_bounds = array<i64: 1, 1>}, {transform_indices = @transform_7, window_bounds = array<i64: 1, 1, 8>}]} {
    %c0 = arith.constant 0 : index
    %c0_0 = arith.constant 0 : index
    %0 = vector.load %arg1[%c0, %c0_0] : memref<8x16xf32, #tpu.memory_space<vmem>>, vector<8x16xf32>
    %c0_1 = arith.constant 0 : index
    %c0_2 = arith.constant 0 : index
    %1 = vector.load %arg2[%c0_1, %c0_2] : memref<16x24xf32, #tpu.memory_space<vmem>>, vector<16x24xf32>
    %c0_3 = arith.constant 0 : index
    %c0_4 = arith.constant 0 : index
    %2 = vector.load %arg3[%c0_3, %c0_4] : memref<1x24xf32, #tpu.memory_space<vmem>>, vector<1x24xf32>
    %cst = arith.constant dense<0.000000e+00> : vector<8x24xf32>
    %3 = tpu.matmul %0, %1, %cst {dimension_numbers = #tpu.dot_dimension_numbers<[1], [0], [0], [1], [0, 0, 1, 1], [], []>} : vector<8x16xf32>, vector<16x24xf32>, vector<8x24xf32> -> vector<8x24xf32>
    %4 = vector.broadcast %2 : vector<1x24xf32> to vector<8x24xf32>
    %5 = arith.addf %3, %4 : vector<8x24xf32>
    %cst_5 = arith.constant 0.000000e+00 : f32
    %6 = vector.broadcast %cst_5 : f32 to vector<8x24xf32>
    %7 = arith.maximumf %5, %6 : vector<8x24xf32>
    %c0_6 = arith.constant 0 : index
    %c0_7 = arith.constant 0 : index
    %8 = vector.load %arg4[%c0_6, %c0_7] : memref<24x12xf32, #tpu.memory_space<vmem>>, vector<24x12xf32>
    %c0_8 = arith.constant 0 : index
    %c0_9 = arith.constant 0 : index
    %9 = vector.load %arg5[%c0_8, %c0_9] : memref<1x12xf32, #tpu.memory_space<vmem>>, vector<1x12xf32>
    %cst_10 = arith.constant dense<0.000000e+00> : vector<8x12xf32>
    %10 = tpu.matmul %7, %8, %cst_10 {dimension_numbers = #tpu.dot_dimension_numbers<[1], [0], [0], [1], [0, 0, 1, 1], [], []>} : vector<8x24xf32>, vector<24x12xf32>, vector<8x12xf32> -> vector<8x12xf32>
    %11 = vector.broadcast %9 : vector<1x12xf32> to vector<8x12xf32>
    %12 = arith.addf %10, %11 : vector<8x12xf32>
    %cst_11 = arith.constant 0.000000e+00 : f32
    %13 = vector.broadcast %cst_11 : f32 to vector<8x12xf32>
    %14 = arith.maximumf %12, %13 : vector<8x12xf32>
    %c0_12 = arith.constant 0 : index
    %c0_13 = arith.constant 0 : index
    %15 = vector.load %arg6[%c0_12, %c0_13] : memref<12x1xf32, #tpu.memory_space<vmem>>, vector<12x1xf32>
    %c0_14 = arith.constant 0 : index
    %c0_15 = arith.constant 0 : index
    %16 = vector.load %arg7[%c0_14, %c0_15] : memref<1x1xf32, #tpu.memory_space<vmem>>, vector<1x1xf32>
    %cst_16 = arith.constant dense<0.000000e+00> : vector<8x1xf32>
    %17 = tpu.matmul %14, %15, %cst_16 {dimension_numbers = #tpu.dot_dimension_numbers<[1], [0], [0], [1], [0, 0, 1, 1], [], []>} : vector<8x12xf32>, vector<12x1xf32>, vector<8x1xf32> -> vector<8x1xf32>
    %18 = vector.broadcast %16 : vector<1x1xf32> to vector<8x1xf32>
    %19 = arith.addf %17, %18 : vector<8x1xf32>
    %20 = tpu.transpose %19, [1, 0] : vector<8x1xf32> -> vector<1x8xf32>
    %21 = vector.shape_cast %20 : vector<1x8xf32> to vector<1x1x8xf32>
    %c0_17 = arith.constant 0 : index
    %c0_18 = arith.constant 0 : index
    %c0_19 = arith.constant 0 : index
    %22 = vector.load %arg8[%c0_17, %c0_18, %c0_19] : memref<1x1x8xf32, #tpu.memory_space<vmem>>, vector<1x1x8xf32>
    tpu.vector_store %arg8[%c0_17, %c0_18, %c0_19], %21 {strides = array<i32>} : memref<1x1x8xf32, #tpu.memory_space<vmem>>, vector<1x1x8xf32>,
    return
  }
  func.func @transform_0(%arg0: i32) -> (i32, i32) {
    %c0_i32 = arith.constant 0 : i32
    %c0_i32_0 = arith.constant 0 : i32
    return %arg0, %c0_i32 : i32, i32
  }
  func.func @transform_1(%arg0: i32) -> (i32, i32) {
    %c0_i32 = arith.constant 0 : i32
    %c0_i32_0 = arith.constant 0 : i32
    %c0_i32_1 = arith.constant 0 : i32
    return %c0_i32, %c0_i32_0 : i32, i32
  }
  func.func @transform_2(%arg0: i32) -> (i32, i32) {
    %c0_i32 = arith.constant 0 : i32
    %c0_i32_0 = arith.constant 0 : i32
    %c0_i32_1 = arith.constant 0 : i32
    return %c0_i32, %c0_i32_0 : i32, i32
  }
  func.func @transform_3(%arg0: i32) -> (i32, i32) {
    %c0_i32 = arith.constant 0 : i32
    %c0_i32_0 = arith.constant 0 : i32
    %c0_i32_1 = arith.constant 0 : i32
    return %c0_i32, %c0_i32_0 : i32, i32
  }
  func.func @transform_4(%arg0: i32) -> (i32, i32) {
    %c0_i32 = arith.constant 0 : i32
    %c0_i32_0 = arith.constant 0 : i32
    %c0_i32_1 = arith.constant 0 : i32
    return %c0_i32, %c0_i32_0 : i32, i32
  }
  func.func @transform_5(%arg0: i32) -> (i32, i32) {
    %c0_i32 = arith.constant 0 : i32
    %c0_i32_0 = arith.constant 0 : i32
    %c0_i32_1 = arith.constant 0 : i32
    return %c0_i32, %c0_i32_0 : i32, i32
  }
  func.func @transform_6(%arg0: i32) -> (i32, i32) {
    %c0_i32 = arith.constant 0 : i32
    %c0_i32_0 = arith.constant 0 : i32
    %c0_i32_1 = arith.constant 0 : i32
    return %c0_i32, %c0_i32_0 : i32, i32
  }
  func.func @transform_7(%arg0: i32) -> (i32, i32, i32) {
    %c0_i32 = arith.constant 0 : i32
    %c0_i32_0 = arith.constant 0 : i32
    %c0_i32_1 = arith.constant 0 : i32
    return %arg0, %c0_i32, %c0_i32_0 : i32, i32, i32
  }
}

</mosaic_0001>

<bundles_post_ra>
// kernel: tpu_custom_call.1
= control target key start
LH: loop header
LB: loop body
LE: loop exit
PB: predicated region body
PF: predicated region fallthrough
CT: control target
= control target key end

     0   :  { %s478_s0 = inlined_call_operand.vmem [shape: f32[8,16], index: 0, kind: input, shape index: {}]   ;;  %s479_s1 = inlined_call_operand.vmem [shape: f32[16,24], index: 1, kind: input, shape index: {}]   ;;  %s480_s2 = inlined_call_operand.vmem [shape: f32[1,24], index: 2, kind: input, shape index: {}]   ;;  %s481_s3 = inlined_call_operand.vmem [shape: f32[24,12], index: 3, kind: input, shape index: {}]   ;;  %s482_s4 = inlined_call_operand.vmem [shape: f32[1,12], index: 4, kind: input, shape index: {}]   ;;  %s483_s5 = inlined_call_operand.vmem [shape: f32[12,1], index: 5, kind: input, shape index: {}]   ;;  %s484_s6 = inlined_call_operand.<no memory space> [shape: f32[1,1], index: 6, kind: input, shape index: {}]   ;;  %s485_s7 = inlined_call_operand.hbm [shape: f32[1,1,8], index: 7, kind: output, shape index: {}]  }
   0x1   :  { %v12_v0 = vstv %s484_s6 }
   0x2   :  { %13 = vst [vmem:[#allocation2] sm:$0x1] %v12_v0 }
   0x3   :  { %v31_v1 = vld [vmem:[%s479_s1 + $0x8] sm:$0xff]  ;;  %v399_v2 = vmov 0.0   ;;  %v30_v3 = vld [vmem:[%s479_s1] sm:$0xff]  ;;  %vm400_vm0 = vmmov 0  }
   0x4   :  { %351 = vmatprep.subr.mxu0 %v399_v2  ;;  %355 = vmatprep.mubr.msk.f32.mxu0 %vm400_vm0, %v399_v2 }
   0x5   :  { %14 = vsyncpa [#allocation4], 0  ;;  %352 = vmatpush3.msra.mxu0 %v31_v1  ;;  %v29_v4 = vld [vmem:[%s478_s0] sm:$0xff]  ;;  %vm39_vm1 = vcmask 130048   ;;  %358 = vmatprep.subr.mxu1 %v399_v2  ;;  %v116_v5 = vld [vmem:[%s481_s3 + $0x10] sm:$0xff]  ;;  %vm124_vm2 = vcmask 195584  }
   0x6   :  { %353 = vmatprep.subr.mxu0 %v399_v2  ;;  %364 = vmatprep.mubr.msk.f32.mxu1 %vm400_vm0, %v399_v2  ;;  %v115_v6 = vld [vmem:[%s481_s3 + $0x8] sm:$0xff]  ;;  %v114_v7 = vld [vmem:[%s481_s3] sm:$0xff]  ;;  %vm212_vm3 = vcmask 1043456   ;;  %vm208_vm4 = vcmask 97280   ;;  %s401_s18 = smov [#allocation3]   ;;  %vm318_vm5 = vcmask 57344  }
   0x7   :  { %354 = vmatpush3.msra.mxu0 %v30_v3  ;;  %359 = vmatpush3.msra.mxu1 %v116_v5  ;;  %v334_v8 = vld [vmem:[%s480_s2] ss:$0 sm:$0xff]  ;;  %v200_v13 = vld [vmem:[%s483_s5 + $0x8] sm:$0xf]  ;;  %s326_s19 = sshll.u32 %s401_s18, 4  ;;  %s327_s19 = int_to_ptr.vmem [resolvable:$true] %s326_s19 }
   0x8   :  { %356 = vmatmul.mubr.msk.f32.vlgmr.msra.gmra.mxu0 %vm39_vm1, %v29_v4  ;;  %367 = vmatprep.subr.mxu0 %v399_v2  ;;  %v199_v14 = vld [vmem:[%s483_s5] sm:$0xff]  ;;  %s377_s5 = scalar_lea.vmem %s327_s19, 16  ;;  %p382_p1 = scmp.lt.s32.totalorder %s327_s19, %s327_s19 }
   0x9   :  { %371 = vmatprep.mubr.msk.f32.mxu0 %vm400_vm0, %v399_v2  ;;  %360 = vmatprep.subr.mxu1 %v399_v2  ;;  %v336_v15 = vld [vmem:[%s482_s4] ss:$0 sm:$0xff]  ;;  %p378_p0 = scmp.ne.s32.totalorder %s327_s19, %s377_s5  ;;  %s381_s4 = scalar_lea.vmem %s327_s19, 32 }
   0xa   :  { %361 = vmatpush3.msra.mxu1 %v115_v6  ;;  %368 = vmatpush3.msk.msra.mxu0 %vm212_vm3, %v200_v13  ;;  %v338_v20 = vld [vmem:[#allocation2] ss:$0 sm:$0xff]  ;;  %p383_p2 = scmp.lt.s32.totalorder %s381_s4, %s377_s5 }
   0xb   :  { %362 = vmatprep.subr.mxu1 %v399_v2  ;;  %369 = vmatprep.subr.mxu0 %v399_v2 }
   0xc   :  { %363 = vmatpush3.msra.mxu1 %v114_v7  ;;  %370 = vmatpush3.msra.mxu0 %v199_v14  ;;  %p384_p3 = por %p383_p2, %p382_p1 }
   0xe   :  { %p385_p4 = pnand %p384_p3, %p378_p0 }
  0xc8   :  { %v109_v9 = vpop.f32.mrf.mxu0 }
  0xc9   :  { %v110_v10 = vadd.f32 %v334_v8, %v109_v9 }
  0xca   :  { %v357_v11 = vpop.f32.mrf.mxu0 }
  0xcb   :  { %v113_v12 = vmax.f32 %v110_v10, 0.0 }
  0xcd   :  { %365 = vmatmul.mubr.msk.f32.vlgmr.msra.gmra.mxu1 %vm124_vm2, %v113_v12 }
 0x18d   :  { %v194_v16 = vpop.f32.mrf.mxu1 }
 0x18e   :  { %v195_v17 = vadd.f32 %v336_v15, %v194_v16 }
 0x18f   :  { %v366_v18 = vpop.f32.mrf.mxu1 }
 0x190   :  { %v198_v19 = vmax.f32 %v195_v17, 0.0 }
 0x192   :  { %372 = vmatmul.mubr.msk.f32.vlgmr.msra.gmra.mxu0 %vm208_vm4, %v198_v19 }
 0x252   :  { %v282_v21 = vpop.f32.mrf.mxu0 }
 0x253   :  { %v283_v22 = vadd.f32 %v338_v20, %v282_v21 }
 0x254   :  { %v373_v23 = vpop.f32.mrf.mxu0 }
 0x255   :  { %286 = vxpose.xlu0.b32.start.end [1/1] (short) (narrow) %v283_v22, 8 }
 0x2d1   :  { %v302_v24 = vpop.trf.xlu0 }
 0x2d2   :  { %319 = vst.msk [vmem:[#allocation3] sm:$0x1] %vm318_vm5, %v302_v24 }
 0x2d3   :  { %388 = shalt.err (!%p385_p4)
}
 0x2d4   :  { %329 = dma.vmem_to_hbm [thread:$0]  %s327_s19, 16, %s485_s7, [#allocation4]  }
 0x2d5   :  { %397 = dma.done.wait [#allocation4], 16  }
 0x2d6   :  { %398 = vsyncadd [#allocation4], 4294967280 }
 0x2d7   :  { %333 = vsyncpa [#allocation4], 1 }

</bundles_post_ra>
